<compile_context>
chip_gen: v7x
topology: tpu7x:2x2x1
jax: 0.10.0
libtpu: 0.0.40
codegen_flags: <defaults>
</compile_context>

<pallas_src>
import jax
import jax.numpy as jnp
from jax.experimental import pallas as pl
from jax.experimental.pallas import tpu as pltpu


def _add_pe_kernel(pe_ref, x_ref, o_ref):
    # pe_ref: (1, Ct)   x_ref / o_ref: (Bt, Ct)
    # pe broadcasts over the batch-row axis; single VPU add per element.
    o_ref[...] = x_ref[...].astype(o_ref.dtype) + pe_ref[...]


def relative_positional_encoding_add(x, emb_weight):
    """x: (batch, n_tokens, d_model); emb_weight: (2*n_tokens - 1, 1) as in nn.Embedding."""
    b, n, d = x.shape
    assert d == n, "PyTorch broadcast x + pe.squeeze() requires d_model == n_tokens"
    vocab = emb_weight.shape[0]
    assert vocab == 2 * n - 1 and emb_weight.shape[1] == 1

    out_dtype = jnp.result_type(x.dtype, emb_weight.dtype)

    # --- O(n^2) Toeplitz construction of pe, done ONCE outside the kernel ---
    # pe[i, j] = table[(j - i) + (n - 1)]
    pos = jnp.arange(n, dtype=jnp.int32)
    offsets = pos[None, :] - pos[:, None] + (n - 1)            # (n, n) in [0, 2n-2]
    pe = jnp.take(emb_weight[:, 0], offsets, axis=0)           # (n, n)
    pe_flat = pe.reshape(1, n * d).astype(out_dtype)           # hoisted one-time cast

    # --- lane-dense 2-D view of x ---
    C = n * d
    x2d = x.reshape(b, C)
    itemsize = jnp.dtype(out_dtype).itemsize

    # Column tile: full width (always legal) or a multiple-of-128 chunk if C is very large.
    if C % 128 == 0 and C > 8192:
        Ct = 8192
        while C % Ct != 0 and Ct > 128:
            Ct //= 2
        if C % Ct != 0:
            Ct = C
    else:
        Ct = C

    # Row tile: target ~1 MiB per block; multiple of 8 sublanes (or the full batch).
    target_rows = max(1, (1 << 20) // (Ct * itemsize))
    if target_rows >= b:
        Bt = b
    else:
        Bt = max(8, (target_rows // 8) * 8)

    grid = (pl.cdiv(b, Bt), pl.cdiv(C, Ct))

    out2d = pl.pallas_call(
        _add_pe_kernel,
        out_shape=jax.ShapeDtypeStruct((b, C), out_dtype),
        grid_spec=pl.GridSpec(
            grid=grid,
            in_specs=[
                pl.BlockSpec((1, Ct), lambda i, j: (0, j)),    # pe: replicated across batch rows
                pl.BlockSpec((Bt, Ct), lambda i, j: (i, j)),   # x block (multi-row, lane-dense)
            ],
            out_specs=pl.BlockSpec((Bt, Ct), lambda i, j: (i, j)),
        ),
        compiler_params=pltpu.CompilerParams(
            dimension_semantics=("parallel", "parallel"),
        ),
    )(pe_flat, x2d)

    return out2d.reshape(b, n, d)


if __name__ == "__main__":
    n_tokens = 16
    d_model = n_tokens  # required by the module's broadcast semantics
    batch = 2

    key = jax.random.PRNGKey(0)
    k_emb, k_x = jax.random.split(key)

    # nn.Embedding(2*n_tokens - 1, 1) weights ~ N(0, 1)
    emb_weight = jax.random.normal(k_emb, (2 * n_tokens - 1, 1), dtype=jnp.float32)
    x = jax.random.normal(k_x, (batch, n_tokens, d_model), dtype=jnp.float32)

    out = relative_positional_encoding_add(x, emb_weight)
    out = jax.block_until_ready(out)

    # Pure-JAX reference for self-check
    pos = jnp.arange(n_tokens)
    offsets = pos[None, :] - pos[:, None] + (n_tokens - 1)        # (n, n) int
    pe_ref = emb_weight[offsets, 0]                               # (n, n)
    ref = x + pe_ref[None, :, :]
    assert jnp.allclose(out, ref, atol=1e-6, rtol=1e-6), "mismatch vs reference"

    print("KERNEL_OK")
</pallas_src>

<mosaic_0001>
module attributes {stable_mosaic.version = 11 : i64} {
  func.func @_add_pe_kernel(%arg0: i32, %arg1: i32, %arg2: memref<1x256xf32, #tpu.memory_space<vmem>>, %arg3: memref<2x256xf32, #tpu.memory_space<vmem>>, %arg4: memref<2x256xf32, #tpu.memory_space<vmem>>) attributes {dimension_semantics = [#tpu.dimension_semantics<parallel>, #tpu.dimension_semantics<parallel>], iteration_bounds = array<i64: 1, 1>, scalar_prefetch = 0 : i64, scratch_operands = 0 : i64, tpu.core_type = #tpu.core_type<tc>, window_params = [{transform_indices = @transform_0, window_bounds = array<i64: 1, 256>}, {transform_indices = @transform_1, window_bounds = array<i64: 2, 256>}, {transform_indices = @transform_2, window_bounds = array<i64: 2, 256>}]} {
    %c0 = arith.constant 0 : index
    %c0_0 = arith.constant 0 : index
    %0 = vector.load %arg3[%c0, %c0_0] : memref<2x256xf32, #tpu.memory_space<vmem>>, vector<2x256xf32>
    %c0_1 = arith.constant 0 : index
    %c0_2 = arith.constant 0 : index
    %1 = vector.load %arg2[%c0_1, %c0_2] : memref<1x256xf32, #tpu.memory_space<vmem>>, vector<1x256xf32>
    %2 = vector.broadcast %1 : vector<1x256xf32> to vector<2x256xf32>
    %3 = arith.addf %0, %2 : vector<2x256xf32>
    %c0_3 = arith.constant 0 : index
    %c0_4 = arith.constant 0 : index
    %4 = vector.load %arg4[%c0_3, %c0_4] : memref<2x256xf32, #tpu.memory_space<vmem>>, vector<2x256xf32>
    tpu.vector_store %arg4[%c0_3, %c0_4], %3 {strides = array<i32>} : memref<2x256xf32, #tpu.memory_space<vmem>>, vector<2x256xf32>,
    return
  }
  func.func @transform_0(%arg0: i32, %arg1: i32) -> (i32, i32) {
    %c0_i32 = arith.constant 0 : i32
    %c0_i32_0 = arith.constant 0 : i32
    return %c0_i32, %arg1 : i32, i32
  }
  func.func @transform_1(%arg0: i32, %arg1: i32) -> (i32, i32) {
    %c0_i32 = arith.constant 0 : i32
    return %arg0, %arg1 : i32, i32
  }
  func.func @transform_2(%arg0: i32, %arg1: i32) -> (i32, i32) {
    %c0_i32 = arith.constant 0 : i32
    return %arg0, %arg1 : i32, i32
  }
}

</mosaic_0001>

<bundles_post_ra>
// kernel: tpu_custom_call.1
= control target key start
LH: loop header
LB: loop body
LE: loop exit
PB: predicated region body
PF: predicated region fallthrough
CT: control target
= control target key end

     0   :  { %7 = vsyncpa [#allocation3], 0  ;;  %s205_s0 = inlined_call_operand.hbm [shape: f32[1,256], index: 0, kind: input, shape index: {}]   ;;  %s206_s1 = inlined_call_operand.hbm [shape: f32[2,256], index: 1, kind: input, shape index: {}]   ;;  %s207_s2 = inlined_call_operand.hbm [shape: f32[2,256], index: 2, kind: output, shape index: {}]  }
   0x1   :  { %8 = vsyncpa [#allocation6], 0 }
   0x2   :  { %9 = vsyncpa [#allocation4], 0  ;;  %s150_s9 = smov [#allocation2]   ;;  %s151_s11 = smov [#allocation5]  }
   0x3   :  { %s16_s10 = sshll.u32 %s150_s9, 4  ;;  %s26_s12 = sshll.u32 %s151_s11, 4  ;;  %s17_s10 = int_to_ptr.vmem [resolvable:$true] %s16_s10  ;;  %s27_s12 = int_to_ptr.vmem [resolvable:$true] %s26_s12 }
   0x4   :  { %s78_s15 = scalar_lea.hbm %s205_s0, 32 }
   0x5   :  { %p79_p0 = scmp.ne.s32.totalorder %s205_s0, %s78_s15  ;;  %p82_p1 = scmp.lt.u32.totalorder %s78_s15, %s205_s0 }
   0x7   :  { %p84_p2 = pnand %p82_p1, %p79_p0 }
   0x9   :  { %87 = shalt.err (!%p84_p2)
}
   0xa   :  { %s88_s20 = scalar_lea.vmem %s17_s10, 32  ;;  %p93_p4 = scmp.lt.s32.totalorder %s17_s10, %s17_s10 }
   0xb   :  { %p89_p3 = scmp.ne.s32.totalorder %s17_s10, %s88_s20  ;;  %p94_p5 = scmp.lt.s32.totalorder %s88_s20, %s88_s20 }
   0xd   :  { %p95_p6 = por %p94_p5, %p93_p4 }
   0xf   :  { %p96_p7 = pnand %p95_p6, %p89_p3 }
  0x11   :  { %99 = shalt.err (!%p96_p7)
}
  0x12   :  { %19 = dma.hbm_to_vmem [thread:$0]  %s205_s0, 32, %s17_s10, [#allocation3]  }
  0x13   :  { %s100_s25 = scalar_lea.hbm %s206_s1, 64 }
  0x14   :  { %p101_p8 = scmp.ne.s32.totalorder %s206_s1, %s100_s25  ;;  %p104_p9 = scmp.lt.u32.totalorder %s100_s25, %s206_s1 }
  0x16   :  { %p106_p10 = pnand %p104_p9, %p101_p8 }
  0x18   :  { %109 = shalt.err (!%p106_p10)
}
  0x19   :  { %s110_s30 = scalar_lea.vmem %s27_s12, 64  ;;  %p115_p12 = scmp.lt.s32.totalorder %s27_s12, %s27_s12 }
  0x1a   :  { %p111_p11 = scmp.ne.s32.totalorder %s27_s12, %s110_s30  ;;  %p116_p13 = scmp.lt.s32.totalorder %s110_s30, %s110_s30 }
  0x1c   :  { %p117_p0 = por %p116_p13, %p115_p12 }
  0x1e   :  { %p118_p1 = pnand %p117_p0, %p111_p11 }
  0x20   :  { %121 = shalt.err (!%p118_p1)
}
  0x21   :  { %29 = dma.hbm_to_vmem [thread:$0]  %s206_s1, 64, %s27_s12, [#allocation6]  }
  0x22   :  { %144 = dma.done.wait [#allocation3], 32  }
  0x23   :  { %145 = vsyncadd [#allocation3], 4294967264 }
  0x24   :  { %146 = dma.done.wait [#allocation6], 64  }
  0x25   :  { %147 = vsyncadd [#allocation6], 4294967232  ;;  %v39_v0 = vlaneseq  ;;  %v152_v1 = vmov 1983009808   ;;  %v37_v7 = vld [vmem:[#allocation2] sm:$0x3] }
  0x26   :  { %v49_v2 = vunpack.c.l.s4 %v152_v1  ;;  %v36_v12 = vld [vmem:[#allocation5] sm:$0xf]  ;;  %s153_s4 = smov [#allocation7]  }
  0x27   :  { %v40_v3 = vshrl.u32 %v39_v0, 7  ;;  %s64_s5 = sshll.u32 %s153_s4, 4  ;;  %s65_s5 = int_to_ptr.vmem [resolvable:$true] %s64_s5 }
  0x28   :  { %v50_v6 = vunpack.c.0.s8 %v49_v2  ;;  %s122_s1 = scalar_lea.vmem %s65_s5, 64  ;;  %p127_p3 = scmp.lt.s32.totalorder %s65_s5, %s65_s5 }
  0x29   :  { %v41_v4 = vsub.s32 0, %v40_v3  ;;  %v45_v5 = vsub.s32 1, %v40_v3  ;;  %p123_p2 = scmp.ne.s32.totalorder %s65_s5, %s122_s1  ;;  %p128_p4 = scmp.lt.s32.totalorder %s122_s1, %s122_s1 }
  0x2a   :  { %v53_v10 = vsub.s32 %v50_v6, %v40_v3 }
  0x2b   :  { %v42_v8 = vrot.slane %v37_v7, %v41_v4  ;;  %v46_v9 = vrot.slane %v37_v7, %v45_v5  ;;  %p129_p5 = por %p128_p4, %p127_p3 }
  0x2d   :  { %v47_v11 = vcombine.low %v42_v8, %v46_v9  ;;  %p130_p6 = pnand %p129_p5, %p123_p2 }
  0x2f   :  { %v54_v13 = vrot.slane %v47_v11, %v53_v10 }
  0x31   :  { %v56_v14 = vadd.f32 %v54_v13, %v36_v12 }
  0x33   :  { %57 = vst [vmem:[#allocation7] sm:$0xf] %v56_v14 }
  0x34   :  { %133 = shalt.err (!%p130_p6)
}
  0x35   :  { %s134_s8 = scalar_lea.hbm %s207_s2, 64 }
  0x36   :  { %p135_p7 = scmp.ne.s32.totalorder %s207_s2, %s134_s8  ;;  %p138_p8 = scmp.lt.u32.totalorder %s134_s8, %s207_s2 }
  0x38   :  { %p140_p9 = pnand %p138_p8, %p135_p7 }
  0x3a   :  { %143 = shalt.err (!%p140_p9)
}
  0x3b   :  { %67 = dma.vmem_to_hbm [thread:$0]  %s65_s5, 64, %s207_s2, [#allocation4]  }
  0x3c   :  { %148 = dma.done.wait [#allocation4], 64  }
  0x3d   :  { %149 = vsyncadd [#allocation4], 4294967232 }
  0x3e   :  { %71 = vsyncpa [#allocation3], 1 }
  0x3f   :  { %72 = vsyncpa [#allocation6], 1 }
  0x40   :  { %73 = vsyncpa [#allocation4], 1 }

</bundles_post_ra>
